<compile_context>
chip_gen: v5e
topology: v5e:2x2
jax: 0.10.0
libtpu: 0.0.40
codegen_flags: <defaults>
</compile_context>

<pallas_src>
import math

import jax
import jax.numpy as jnp
from jax.experimental import pallas as pl
from jax.experimental.pallas import tpu as pltpu


# ---------------------------------------------------------------------------
# Tiled, pipelined linear:  out = x @ w + b   (bf16 MXU operands, f32 accum)
# ---------------------------------------------------------------------------

def _matmul_kernel(x_ref, w_ref, b_ref, o_ref, acc_ref):
    k = pl.program_id(2)

    @pl.when(k == 0)
    def _init():
        acc_ref[...] = jnp.zeros_like(acc_ref)

    acc_ref[...] += jnp.dot(
        x_ref[...].astype(jnp.bfloat16),
        w_ref[...].astype(jnp.bfloat16),
        preferred_element_type=jnp.float32,
    )

    @pl.when(k == pl.num_programs(2) - 1)
    def _finalize():
        o_ref[...] = (acc_ref[...] + b_ref[...].astype(jnp.float32)).astype(o_ref.dtype)


def _pick_tile(dim, target):
    # Full dim when small / non-divisible (keeps the (8,128) BlockSpec rule trivially
    # satisfied); otherwise a 256/512-multiple tile sized for the 2x256x256 MXU and
    # well inside v7x's 64 MiB VMEM with double buffering.
    if dim <= target or dim % target != 0:
        return dim
    return target


def linear_tiled(x, w, b, *, out_dtype=jnp.float32, tm=256, tn=256, tk=512):
    """x: (M, K) f32, w: (K, N) bf16/f32, b: (N,) f32 -> (M, N) = x @ w + b."""
    M, K = x.shape
    Kw, N = w.shape
    assert K == Kw and b.shape == (N,)

    bm, bn, bk = _pick_tile(M, tm), _pick_tile(N, tn), _pick_tile(K, tk)
    grid = (M // bm, N // bn, K // bk)

    cost = pl.CostEstimate(
        flops=2 * M * N * K,
        transcendentals=0,
        bytes_accessed=int(x.size * x.dtype.itemsize
                           + w.size * w.dtype.itemsize
                           + b.size * 4 + M * N * 4),
    )

    return pl.pallas_call(
        _matmul_kernel,
        out_shape=jax.ShapeDtypeStruct((M, N), out_dtype),
        grid_spec=pltpu.PrefetchScalarGridSpec(
            num_scalar_prefetch=0,
            grid=grid,
            in_specs=[
                pl.BlockSpec((bm, bk), lambda i, j, k: (i, k)),
                pl.BlockSpec((bk, bn), lambda i, j, k: (k, j)),
                pl.BlockSpec((1, bn), lambda i, j, k: (0, j)),
            ],
            out_specs=pl.BlockSpec((bm, bn), lambda i, j, k: (i, j)),
            scratch_shapes=[pltpu.VMEM((bm, bn), jnp.float32)],
        ),
        compiler_params=pltpu.CompilerParams(
            dimension_semantics=("parallel", "parallel", "arbitrary"),
            vmem_limit_bytes=48 * 1024 * 1024,
        ),
        cost_estimate=cost,
    )(x, w, b.reshape(1, N))


# ---------------------------------------------------------------------------
# Attention core: several (batch, head) pairs per grid step
# ---------------------------------------------------------------------------

def _attn_kernel(qkv_ref, o_ref):
    # qkv_ref: (3, BH, L, Dh) f32 (q already scaled via folded weights); o_ref: (BH, L, Dh)
    q = qkv_ref[0].astype(jnp.bfloat16)
    k = qkv_ref[1].astype(jnp.bfloat16)
    v = qkv_ref[2].astype(jnp.bfloat16)

    s = jnp.einsum("bld,bmd->blm", q, k,
                   preferred_element_type=jnp.float32)         # (BH, L, L) f32
    m = jnp.max(s, axis=-1, keepdims=True)
    p = jnp.exp(s - m)                                         # softmax math in f32
    p = p * pl.reciprocal(jnp.sum(p, axis=-1, keepdims=True), approx=True)

    ctx = jnp.einsum("blm,bmd->bld", p.astype(jnp.bfloat16), v,
                     preferred_element_type=jnp.float32)
    o_ref[...] = ctx.astype(o_ref.dtype)


def _pick_head_block(nh, seq_len, target=8):
    # Cap so the per-step (bh, L, L) f32 score tile stays ~<= 4 MiB (v7x-safe),
    # and keep at least 2 grid steps when possible so megacore can shard them.
    cap = max(1, (4 * 1024 * 1024) // max(1, 4 * seq_len * seq_len))
    target = max(1, min(target, cap, nh))
    best = 1
    for cand in range(1, target + 1):
        if nh % cand == 0 and nh // cand >= 2:
            best = cand
    return best


def attention_heads(qkv):
    """qkv: (3, N*H, L, Dh) f32 -> context (N*H, L, Dh) f32."""
    three, NH, L, Dh = qkv.shape
    assert three == 3
    bh = _pick_head_block(NH, L)
    grid = (NH // bh,)

    cost = pl.CostEstimate(
        flops=4 * NH * L * L * Dh,
        transcendentals=NH * L * L,
        bytes_accessed=int(qkv.size * qkv.dtype.itemsize + NH * L * Dh * 4),
    )

    return pl.pallas_call(
        _attn_kernel,
        out_shape=jax.ShapeDtypeStruct((NH, L, Dh), jnp.float32),
        grid=grid,
        in_specs=[pl.BlockSpec((3, bh, L, Dh), lambda b: (0, b, 0, 0))],
        out_specs=pl.BlockSpec((bh, L, Dh), lambda b: (b, 0, 0)),
        compiler_params=pltpu.CompilerParams(
            dimension_semantics=("parallel",),
            vmem_limit_bytes=48 * 1024 * 1024,
        ),
        cost_estimate=cost,
    )(qkv)


# ---------------------------------------------------------------------------
# Module wrapper
# ---------------------------------------------------------------------------

class MultiHeadAttentionPallas:
    def __init__(self, embed_dim, num_heads, key):
        assert embed_dim % num_heads == 0
        self.embed_dim = embed_dim
        self.num_heads = num_heads
        head_dim = embed_dim // num_heads

        k1, k2, k3, k4 = jax.random.split(key, 4)
        lim = math.sqrt(6.0 / (2 * embed_dim))  # xavier_uniform-like
        # nn.MultiheadAttention parameter shapes (kept as-is for the reference path):
        #   in_proj_weight: (3E, E), in_proj_bias: (3E,)
        #   out_proj.weight: (E, E), out_proj.bias: (E,)
        self.in_proj_weight = jax.random.uniform(
            k1, (3 * embed_dim, embed_dim), jnp.float32, -lim, lim)
        self.in_proj_bias = jax.random.uniform(
            k2, (3 * embed_dim,), jnp.float32, -0.1, 0.1)
        self.out_proj_weight = jax.random.uniform(
            k3, (embed_dim, embed_dim), jnp.float32, -lim, lim)
        self.out_proj_bias = jax.random.uniform(
            k4, (embed_dim,), jnp.float32, -0.1, 0.1)

        # Derived, kernel-friendly parameters (computed once, not per call):
        #  * pre-transposed into x @ W layout
        #  * 1/sqrt(Dh) folded into the Q columns / Q bias (no in-kernel scale)
        #  * weights stored in bf16 (MXU operands); biases stay f32
        scale = 1.0 / math.sqrt(head_dim)
        col_scale = jnp.concatenate([
            jnp.full((embed_dim,), scale, jnp.float32),
            jnp.ones((2 * embed_dim,), jnp.float32),
        ])
        self._w_in = (self.in_proj_weight.T * col_scale[None, :]).astype(jnp.bfloat16)
        self._b_in = self.in_proj_bias * col_scale
        self._w_out = self.out_proj_weight.T.astype(jnp.bfloat16)
        self._b_out = self.out_proj_bias

    def __call__(self, x):
        # x: (L, N, E)
        L, N, E = x.shape
        H = self.num_heads
        Dh = E // H

        x_flat = x.reshape(L * N, E)

        # Packed QKV projection (tiled Pallas matmul, bf16 MXU, f32 accumulate).
        qkv = linear_tiled(x_flat, self._w_in, self._b_in)          # (L*N, 3E) f32

        # (L*N, 3E) -> (L, N, 3, H, Dh) -> (3, N, H, L, Dh) -> (3, N*H, L, Dh)
        qkv_heads = (qkv.reshape(L, N, 3, H, Dh)
                        .transpose(2, 1, 3, 0, 4)
                        .reshape(3, N * H, L, Dh))

        ctx = attention_heads(qkv_heads)                            # (N*H, L, Dh) f32

        # (N*H, L, Dh) -> (L, N, H*Dh) = (L*N, E)   (torch's head-concat ordering)
        ctx_flat = (ctx.reshape(N, H, L, Dh)
                       .transpose(2, 0, 1, 3)
                       .reshape(L * N, E))

        out = linear_tiled(ctx_flat, self._w_out, self._b_out)      # (L*N, E) f32
        return out.reshape(L, N, E)

    # plain-JAX f32 reference (original, unscaled parameters) for correctness checking
    def reference(self, x):
        L, N, E = x.shape
        H = self.num_heads
        Dh = E // H
        qkv = x.reshape(L * N, E) @ self.in_proj_weight.T + self.in_proj_bias
        q, k, v = jnp.split(qkv, 3, axis=-1)

        def to_heads(t):
            return t.reshape(L, N, H, Dh).transpose(1, 2, 0, 3).reshape(N * H, L, Dh)

        qh, kh, vh = map(to_heads, (q, k, v))
        s = jnp.einsum("bld,bmd->blm", qh / math.sqrt(Dh), kh)
        p = jax.nn.softmax(s, axis=-1)
        ctx = jnp.einsum("blm,bmd->bld", p, vh)
        ctx = ctx.reshape(N, H, L, Dh).transpose(2, 0, 1, 3).reshape(L * N, E)
        out = ctx @ self.out_proj_weight.T + self.out_proj_bias
        return out.reshape(L, N, E)


if __name__ == "__main__":
    key = jax.random.PRNGKey(0)
    k_param, k_x = jax.random.split(key)

    L, N, E, H = 8, 2, 32, 4        # seq, batch, embed_dim, num_heads
    mha = MultiHeadAttentionPallas(E, H, k_param)
    x = jax.random.normal(k_x, (L, N, E), dtype=jnp.float32)

    out = jax.block_until_ready(mha(x))
    ref = mha.reference(x)

    assert out.shape == (L, N, E)
    # bf16 MXU operands + approx reciprocal => looser tolerance vs the f32 reference.
    err = float(jnp.max(jnp.abs(out - ref)))
    assert jnp.allclose(out, ref, rtol=5e-2, atol=5e-2), (
        "mismatch vs JAX reference, max abs err = %g" % err)

    print("KERNEL_OK")
</pallas_src>

<mosaic_0001>
module attributes {stable_mosaic.version = 11 : i64} {
  func.func @_matmul_kernel(%arg0: i32, %arg1: i32, %arg2: i32, %arg3: memref<16x32xf32, #tpu.memory_space<vmem>>, %arg4: memref<32x96xbf16, #tpu.memory_space<vmem>>, %arg5: memref<1x96xf32, #tpu.memory_space<vmem>>, %arg6: memref<16x96xf32, #tpu.memory_space<vmem>>, %arg7: memref<16x96xf32, #tpu.memory_space<vmem>>) attributes {dimension_semantics = [#tpu.dimension_semantics<parallel>, #tpu.dimension_semantics<parallel>, #tpu.dimension_semantics<arbitrary>], iteration_bounds = array<i64: 1, 1, 1>, scalar_prefetch = 0 : i64, scratch_operands = 1 : i64, tpu.core_type = #tpu.core_type<tc>, window_params = [{transform_indices = @transform_0, window_bounds = array<i64: 16, 32>}, {transform_indices = @transform_1, window_bounds = array<i64: 32, 96>}, {transform_indices = @transform_2, window_bounds = array<i64: 1, 96>}, {transform_indices = @transform_3, window_bounds = array<i64: 16, 96>}]} {
    %c0_i32 = arith.constant 0 : i32
    %0 = arith.cmpi eq, %arg2, %c0_i32 : i32
    %1 = arith.extui %0 : i1 to i32
    %c0_i32_0 = arith.constant 0 : i32
    %2 = arith.cmpi ne, %1, %c0_i32_0 : i32
    scf.if %2 {
      %cst_10 = arith.constant 0.000000e+00 : f32
      %13 = vector.broadcast %cst_10 : f32 to vector<16x96xf32>
      %c0_11 = arith.constant 0 : index
      %c0_12 = arith.constant 0 : index
      %14 = vector.load %arg7[%c0_11, %c0_12] : memref<16x96xf32, #tpu.memory_space<vmem>>, vector<16x96xf32>
      tpu.vector_store %arg7[%c0_11, %c0_12], %13 {strides = array<i32>} : memref<16x96xf32, #tpu.memory_space<vmem>>, vector<16x96xf32>,
    } else {
    }
    %c0 = arith.constant 0 : index
    %c0_1 = arith.constant 0 : index
    %3 = vector.load %arg7[%c0, %c0_1] : memref<16x96xf32, #tpu.memory_space<vmem>>, vector<16x96xf32>
    %c0_2 = arith.constant 0 : index
    %c0_3 = arith.constant 0 : index
    %4 = vector.load %arg3[%c0_2, %c0_3] : memref<16x32xf32, #tpu.memory_space<vmem>>, vector<16x32xf32>
    %5 = arith.truncf %4 : vector<16x32xf32> to vector<16x32xbf16>
    %c0_4 = arith.constant 0 : index
    %c0_5 = arith.constant 0 : index
    %6 = vector.load %arg4[%c0_4, %c0_5] : memref<32x96xbf16, #tpu.memory_space<vmem>>, vector<32x96xbf16>
    %cst = arith.constant dense<0.000000e+00> : vector<16x96xf32>
    %7 = tpu.matmul %5, %6, %cst {dimension_numbers = #tpu.dot_dimension_numbers<[1], [0], [0], [1], [0, 0, 1, 1], [], []>} : vector<16x32xbf16>, vector<32x96xbf16>, vector<16x96xf32> -> vector<16x96xf32>
    %8 = arith.addf %3, %7 : vector<16x96xf32>
    %c0_6 = arith.constant 0 : index
    %c0_7 = arith.constant 0 : index
    %9 = vector.load %arg7[%c0_6, %c0_7] : memref<16x96xf32, #tpu.memory_space<vmem>>, vector<16x96xf32>
    tpu.vector_store %arg7[%c0_6, %c0_7], %8 {strides = array<i32>} : memref<16x96xf32, #tpu.memory_space<vmem>>, vector<16x96xf32>,
    %c0_i32_8 = arith.constant 0 : i32
    %10 = arith.cmpi eq, %arg2, %c0_i32_8 : i32
    %11 = arith.extui %10 : i1 to i32
    %c0_i32_9 = arith.constant 0 : i32
    %12 = arith.cmpi ne, %11, %c0_i32_9 : i32
    scf.if %12 {
      %c0_10 = arith.constant 0 : index
      %c0_11 = arith.constant 0 : index
      %13 = vector.load %arg7[%c0_10, %c0_11] : memref<16x96xf32, #tpu.memory_space<vmem>>, vector<16x96xf32>
      %c0_12 = arith.constant 0 : index
      %c0_13 = arith.constant 0 : index
      %14 = vector.load %arg5[%c0_12, %c0_13] : memref<1x96xf32, #tpu.memory_space<vmem>>, vector<1x96xf32>
      %15 = vector.broadcast %14 : vector<1x96xf32> to vector<16x96xf32>
      %16 = arith.addf %13, %15 : vector<16x96xf32>
      %c0_14 = arith.constant 0 : index
      %c0_15 = arith.constant 0 : index
      %17 = vector.load %arg6[%c0_14, %c0_15] : memref<16x96xf32, #tpu.memory_space<vmem>>, vector<16x96xf32>
      tpu.vector_store %arg6[%c0_14, %c0_15], %16 {strides = array<i32>} : memref<16x96xf32, #tpu.memory_space<vmem>>, vector<16x96xf32>,
    } else {
    }
    return
  }
  func.func @transform_0(%arg0: i32, %arg1: i32, %arg2: i32) -> (i32, i32) {
    %c0_i32 = arith.constant 0 : i32
    return %arg0, %arg2 : i32, i32
  }
  func.func @transform_1(%arg0: i32, %arg1: i32, %arg2: i32) -> (i32, i32) {
    %c0_i32 = arith.constant 0 : i32
    return %arg2, %arg1 : i32, i32
  }
  func.func @transform_2(%arg0: i32, %arg1: i32, %arg2: i32) -> (i32, i32) {
    %c0_i32 = arith.constant 0 : i32
    %c0_i32_0 = arith.constant 0 : i32
    return %c0_i32, %arg1 : i32, i32
  }
  func.func @transform_3(%arg0: i32, %arg1: i32, %arg2: i32) -> (i32, i32) {
    %c0_i32 = arith.constant 0 : i32
    return %arg0, %arg1 : i32, i32
  }
}

</mosaic_0001>

<bundles_post_ra>
// kernel: tpu_custom_call.1
= control target key start
LH: loop header
LB: loop body
LE: loop exit
PB: predicated region body
PF: predicated region fallthrough
CT: control target
= control target key end

     0   :  { %8 = vsyncpa [#allocation4], 0  ;;  %s282_s0 = inlined_call_operand.hbm [shape: f32[16,32], index: 0, kind: input, shape index: {}]   ;;  %s283_s1 = inlined_call_operand.hbm [shape: bf16[32,96], index: 1, kind: input, shape index: {}]   ;;  %s284_s2 = inlined_call_operand.vmem [shape: f32[1,96], index: 2, kind: input, shape index: {}]   ;;  %s285_s3 = inlined_call_operand.hbm [shape: f32[16,96], index: 3, kind: output, shape index: {}]  }
   0x1   :  { %9 = vsyncpa [#allocation7], 0 }
   0x2   :  { %10 = vsyncpa [#allocation5], 0  ;;  %s15_s14 = sshll.u32 %s282_s0, 4  ;;  %s230_s15 = smov [#allocation3]   ;;  %s16_s14 = int_to_ptr.hbm [resolvable:$true] %s15_s14 }
   0x3   :  { %s17_s16 = sshll.u32 %s230_s15, 4  ;;  %s28_s19 = sshll.u32 %s283_s1, 4  ;;  %s18_s16 = int_to_ptr.vmem [resolvable:$true] %s17_s16  ;;  %s29_s19 = int_to_ptr.hbm [resolvable:$true] %s28_s19 }
   0x4   :  { %s231_s20 = smov 128   ;;  %s232_s21 = smov 8  }
   0x5   :  { %23 = dma.hbm_to_vmem [thread:$0]  %s16_s14, 256, %s18_s16, [#allocation4], %s231_s20, %s231_s20, %s232_s21  }
   0x6   :  { %s233_s22 = smov [#allocation6]   ;;  %s234_s24 = smov 64  }
   0x7   :  { %s30_s23 = sshll.u32 %s233_s22, 4  ;;  %s235_s0 = smov 4   ;;  %s31_s23 = int_to_ptr.vmem [resolvable:$true] %s30_s23 }
   0x8   :  { %36 = dma.hbm_to_vmem [thread:$0]  %s29_s19, 256, %s31_s23, [#allocation7], %s234_s24, %s234_s24, %s235_s0  }
   0x9   :  { %224 = dma.done.wait [#allocation4], 256  }
   0xa   :  { %225 = vsyncadd [#allocation4], 4294967040 }
   0xb   :  { %226 = dma.done.wait [#allocation7], 256  }
   0xc   :  { %227 = vsyncadd [#allocation7], 4294967040  ;;  %vm52_vm0 = vcmask 785408   ;;  %v236_v0 = vmov 0.0   ;;  %v142_v1 = vld [vmem:[#allocation6 + $0x8] sm:$0xff]  ;;  %v141_v2 = vld [vmem:[#allocation6] sm:$0xff] }
   0xd   :  { %53 = vst.msk [vmem:[#allocation2] sm:$0xff] %vm52_vm0, %v236_v0  ;;  %86 = vmatpush.bf16.msra.mxu0 %v142_v1  ;;  %v57_v3 = vld [vmem:[#allocation3] sm:$0xff]  ;;  %v58_v4 = vld [vmem:[#allocation3 + $0x8] sm:$0xff]  ;;  %vm76_vm1 = vcmask 261120   ;;  %v151_v10 = vld [vmem:[%s284_s2] ss:$0 sm:$0xff] }
   0xe   :  { %54 = vst.msk [vmem:[#allocation2 + $0x8] sm:$0xff] %vm52_vm0, %v236_v0  ;;  %v59_v5 = vpack.c.bf16 %v58_v4, %v57_v3  ;;  %s237_s26 = smov [#allocation8]   ;;  %s118_s30 = sshll.u32 %s285_s3, 4  ;;  %s119_s30 = int_to_ptr.hbm [resolvable:$true] %s118_s30 }
   0xf   :  { %s116_s27 = sshll.u32 %s237_s26, 4  ;;  %s117_s27 = int_to_ptr.vmem [resolvable:$true] %s116_s27 }
  0x11   :  { %87 = vmatpush.bf16.msra.mxu0 %v141_v2 }
  0x14   :  { %140 = vmatmul.msk.bf16.vlgmr.msra.gmra.mxu0 %vm76_vm1, %v59_v5  ;;  %v55_v6 = vld [vmem:[#allocation2] sm:$0xff] }
  0x15   :  { %v56_v9 = vld [vmem:[#allocation2 + $0x8] sm:$0xff] }
  0x91   :  { %v89_v7 = vpop.f32.mrf.mxu0 }
  0x92   :  { %v94_v8 = vadd.f32 %v89_v7, %v55_v6 }
  0x94   :  { %97 = vst.msk [vmem:[#allocation2] sm:$0xff] %vm52_vm0, %v94_v8 }
  0x99   :  { %v91_v11 = vpop.f32.mrf.mxu0 }
  0x9a   :  { %v95_v12 = vadd.f32 %v91_v11, %v56_v9 }
  0x9b   :  { %v102_v13 = vld [vmem:[#allocation2] sm:$0xff] }
  0x9c   :  { %98 = vst.msk [vmem:[#allocation2 + $0x8] sm:$0xff] %vm52_vm0, %v95_v12  ;;  %v108_v14 = vadd.f32 %v151_v10, %v102_v13 }
  0x9e   :  { %110 = vst.msk [vmem:[#allocation8] sm:$0xff] %vm52_vm0, %v108_v14 }
  0xa3   :  { %v103_v15 = vld [vmem:[#allocation2 + $0x8] sm:$0xff] }
  0xa4   :  { %v109_v16 = vadd.f32 %v151_v10, %v103_v15 }
  0xa6   :  { %111 = vst.msk [vmem:[#allocation8 + $0x8] sm:$0xff] %vm52_vm0, %v109_v16 }
  0xa7   :  { %124 = dma.vmem_to_hbm [thread:$0]  %s117_s27, 256, %s119_s30, [#allocation5], %s231_s20, %s231_s20, %s232_s21  }
  0xa8   :  { %228 = dma.done.wait [#allocation5], 256  }
  0xa9   :  { %229 = vsyncadd [#allocation5], 4294967040 }
  0xaa   :  { %129 = vsyncpa [#allocation4], 1 }
  0xab   :  { %130 = vsyncpa [#allocation7], 1 }
  0xac   :  { %131 = vsyncpa [#allocation5], 1 }

</bundles_post_ra>
